<compile_context>
chip_gen: v7x
topology: tpu7x:2x2x1
jax: 0.10.0
libtpu: 0.0.40
codegen_flags: <defaults>
</compile_context>

<pallas_src>
import jax
import jax.numpy as jnp
from jax.experimental import pallas as pl
from jax.experimental.pallas import tpu as pltpu

LANES = 128        # lanes per vreg
SUBLANES = 8       # sublanes per vreg
SENTINEL = -1e9    # sigmoid(SENTINEL) == 0 exactly under the tanh formulation


def _proxy_coop_loss_kernel(g_ref, out_ref, acc_ref):
    j = pl.program_id(1)

    @pl.when(j == 0)
    def _():
        acc_ref[...] = jnp.zeros_like(acc_ref)

    g = g_ref[...].astype(jnp.float32)          # (block_rows, 128)
    # sigmoid(x) = 0.5 * (tanh(0.5 * x) + 1): single EUP pass per element.
    s = 0.5 * (jnp.tanh(0.5 * g) + 1.0)
    br = g.shape[0]
    # Fold the (block_rows, 128) tile onto the (8, 128) accumulator:
    # pure vreg (VPU) adds, no cross-lane XLU work in the hot loop.
    acc_ref[...] += jnp.sum(s.reshape(br // SUBLANES, SUBLANES, LANES), axis=0)

    @pl.when(j == pl.num_programs(1) - 1)
    def _():
        out_ref[0] = acc_ref[...]               # lane-dense (8,128) partial


def proxy_coop_loss(gains: jax.Array, *, block_rows: int = 2048,
                    num_partials: int = 2, min_kernel_n: int = 65536) -> jax.Array:
    """loss = -sum_i sigmoid(gains[i]); gains[i] = agent i's last_expected_gain."""
    n = gains.shape[0]
    if gains.dtype not in (jnp.float32, jnp.bfloat16):
        gains = gains.astype(jnp.float32)

    if n < min_kernel_n:
        # Tiny populations: pallas_call fixed cost + padding would dominate.
        return -jnp.sum(jax.nn.sigmoid(gains.astype(jnp.float32)))

    # Round the slab up to whole (block_rows x 128) blocks per partial.
    rows = max(SUBLANES, -(-n // LANES))
    rows = -(-rows // SUBLANES) * SUBLANES
    br = max(SUBLANES, (min(block_rows, rows) // SUBLANES) * SUBLANES)
    chunk = num_partials * br
    padded_rows = -(-rows // chunk) * chunk
    blocks_per_partial = padded_rows // chunk

    # Single pad (sentinel) + reshape; no mask array, no zeros+scatter passes.
    slab = jnp.pad(gains, (0, padded_rows * LANES - n),
                   constant_values=SENTINEL).reshape(padded_rows, LANES)

    partials = pl.pallas_call(
        _proxy_coop_loss_kernel,
        out_shape=jax.ShapeDtypeStruct((num_partials, SUBLANES, LANES),
                                       jnp.float32),
        grid_spec=pltpu.PrefetchScalarGridSpec(
            num_scalar_prefetch=0,
            grid=(num_partials, blocks_per_partial),
            in_specs=[pl.BlockSpec(
                (br, LANES),
                lambda p, j: (p * blocks_per_partial + j, 0))],
            out_specs=pl.BlockSpec((1, SUBLANES, LANES),
                                   lambda p, j: (p, 0, 0)),
            scratch_shapes=[pltpu.VMEM((SUBLANES, LANES), jnp.float32)],
        ),
        compiler_params=pltpu.CompilerParams(
            dimension_semantics=("parallel", "arbitrary"),
        ),
    )(slab)
    return -jnp.sum(partials)


if __name__ == "__main__":
    key = jax.random.PRNGKey(0)
    k1, k2 = jax.random.split(key)

    # Small population, forced through the Pallas kernel (grid (2, 1)).
    gains_small = jax.random.normal(k1, (1000,), dtype=jnp.float32)
    loss_small = jax.block_until_ready(proxy_coop_loss(gains_small, min_kernel_n=0))
    ref_small = -jnp.sum(jax.nn.sigmoid(gains_small))
    assert jnp.allclose(loss_small, ref_small, rtol=1e-5, atol=1e-5), (loss_small, ref_small)

    # Larger population with small blocks: exercises multi-step accumulation
    # per partial (grid (2, 2)) plus sentinel padding.
    gains_big = jax.random.normal(k2, (20000,), dtype=jnp.float32) * 3.0
    loss_big = jax.block_until_ready(
        proxy_coop_loss(gains_big, block_rows=64, min_kernel_n=0))
    ref_big = -jnp.sum(jax.nn.sigmoid(gains_big))
    assert jnp.allclose(loss_big, ref_big, rtol=1e-5, atol=1e-4), (loss_big, ref_big)

    # Tiny-population bypass path (pure XLA), matches the module semantics too.
    gains_tiny = jax.random.normal(key, (16,), dtype=jnp.float32)
    loss_tiny = jax.block_until_ready(proxy_coop_loss(gains_tiny))
    ref_tiny = -jnp.sum(jax.nn.sigmoid(gains_tiny))
    assert jnp.allclose(loss_tiny, ref_tiny, rtol=1e-5, atol=1e-5), (loss_tiny, ref_tiny)

    print("KERNEL_OK")
</pallas_src>

<mosaic_0001>
module attributes {stable_mosaic.version = 11 : i64} {
  func.func @_proxy_coop_loss_kernel(%arg0: i32, %arg1: i32, %arg2: memref<8x128xf32, #tpu.memory_space<vmem>>, %arg3: memref<1x8x128xf32, #tpu.memory_space<vmem>>, %arg4: memref<8x128xf32, #tpu.memory_space<vmem>>) attributes {dimension_semantics = [#tpu.dimension_semantics<parallel>, #tpu.dimension_semantics<arbitrary>], iteration_bounds = array<i64: 2, 1>, scalar_prefetch = 0 : i64, scratch_operands = 1 : i64, tpu.core_type = #tpu.core_type<tc>, window_params = [{transform_indices = @transform_0, window_bounds = array<i64: 8, 128>}, {transform_indices = @transform_1, window_bounds = array<i64: 1, 8, 128>}]} {
    %c0_i32 = arith.constant 0 : i32
    %0 = arith.cmpi eq, %arg1, %c0_i32 : i32
    %1 = arith.extui %0 : i1 to i32
    %c0_i32_0 = arith.constant 0 : i32
    %2 = arith.cmpi ne, %1, %c0_i32_0 : i32
    scf.if %2 {
      %cst_11 = arith.constant 0.000000e+00 : f32
      %19 = vector.broadcast %cst_11 : f32 to vector<8x128xf32>
      %c0_12 = arith.constant 0 : index
      %c0_13 = arith.constant 0 : index
      %20 = vector.load %arg4[%c0_12, %c0_13] : memref<8x128xf32, #tpu.memory_space<vmem>>, vector<8x128xf32>
      tpu.vector_store %arg4[%c0_12, %c0_13], %19 {strides = array<i32>} : memref<8x128xf32, #tpu.memory_space<vmem>>, vector<8x128xf32>,
    } else {
    }
    %c0 = arith.constant 0 : index
    %c0_1 = arith.constant 0 : index
    %3 = vector.load %arg2[%c0, %c0_1] : memref<8x128xf32, #tpu.memory_space<vmem>>, vector<8x128xf32>
    %cst = arith.constant 5.000000e-01 : f32
    %4 = vector.broadcast %cst : f32 to vector<8x128xf32>
    %5 = arith.mulf %4, %3 : vector<8x128xf32>
    %6 = math.tanh %5 : vector<8x128xf32>
    %cst_2 = arith.constant 1.000000e+00 : f32
    %7 = vector.broadcast %cst_2 : f32 to vector<8x128xf32>
    %8 = arith.addf %6, %7 : vector<8x128xf32>
    %cst_3 = arith.constant 5.000000e-01 : f32
    %9 = vector.broadcast %cst_3 : f32 to vector<8x128xf32>
    %10 = arith.mulf %9, %8 : vector<8x128xf32>
    %c0_4 = arith.constant 0 : index
    %c0_5 = arith.constant 0 : index
    %11 = vector.load %arg4[%c0_4, %c0_5] : memref<8x128xf32, #tpu.memory_space<vmem>>, vector<8x128xf32>
    %12 = vector.shape_cast %10 : vector<8x128xf32> to vector<1x8x128xf32>
    %cst_6 = arith.constant dense<0.000000e+00> : vector<8x128xf32>
    %13 = vector.multi_reduction <add>, %12, %cst_6 [0] : vector<1x8x128xf32> to vector<8x128xf32>
    %14 = arith.addf %11, %13 : vector<8x128xf32>
    %c0_7 = arith.constant 0 : index
    %c0_8 = arith.constant 0 : index
    %15 = vector.load %arg4[%c0_7, %c0_8] : memref<8x128xf32, #tpu.memory_space<vmem>>, vector<8x128xf32>
    tpu.vector_store %arg4[%c0_7, %c0_8], %14 {strides = array<i32>} : memref<8x128xf32, #tpu.memory_space<vmem>>, vector<8x128xf32>,
    %c0_i32_9 = arith.constant 0 : i32
    %16 = arith.cmpi eq, %arg1, %c0_i32_9 : i32
    %17 = arith.extui %16 : i1 to i32
    %c0_i32_10 = arith.constant 0 : i32
    %18 = arith.cmpi ne, %17, %c0_i32_10 : i32
    scf.if %18 {
      %c0_11 = arith.constant 0 : index
      %c0_12 = arith.constant 0 : index
      %19 = vector.load %arg4[%c0_11, %c0_12] : memref<8x128xf32, #tpu.memory_space<vmem>>, vector<8x128xf32>
      %c0_13 = arith.constant 0 : index
      %c0_14 = arith.constant 0 : index
      %c0_15 = arith.constant 0 : index
      %20 = vector.load %arg3[%c0_13, %c0_14, %c0_15] : memref<1x8x128xf32, #tpu.memory_space<vmem>>, vector<1x8x128xf32>
      %21 = vector.shape_cast %20 : vector<1x8x128xf32> to vector<8x128xf32>
      %22 = vector.shape_cast %19 : vector<8x128xf32> to vector<1x8x128xf32>
      tpu.vector_store %arg3[%c0_13, %c0_14, %c0_15], %22 {strides = array<i32>} : memref<1x8x128xf32, #tpu.memory_space<vmem>>, vector<1x8x128xf32>,
    } else {
    }
    return
  }
  func.func @transform_0(%arg0: i32, %arg1: i32) -> (i32, i32) {
    %c1_i32 = arith.constant 1 : i32
    %0 = arith.muli %arg0, %c1_i32 : i32
    %1 = arith.addi %0, %arg1 : i32
    %c0_i32 = arith.constant 0 : i32
    %c0_i32_0 = arith.constant 0 : i32
    return %1, %c0_i32 : i32, i32
  }
  func.func @transform_1(%arg0: i32, %arg1: i32) -> (i32, i32, i32) {
    %c0_i32 = arith.constant 0 : i32
    %c0_i32_0 = arith.constant 0 : i32
    %c0_i32_1 = arith.constant 0 : i32
    return %arg0, %c0_i32, %c0_i32_0 : i32, i32, i32
  }
}

</mosaic_0001>

<bundles_post_ra>
// kernel: tpu_custom_call.1
= control target key start
LH: loop header
LB: loop body
LE: loop exit
PB: predicated region body
PF: predicated region fallthrough
CT: control target
= control target key end

     0   :  { %6 = vsyncpa [#allocation4], 0  ;;  %s635_s0 = inlined_call_operand.hbm [shape: f32[16,128], index: 0, kind: input, shape index: {}]   ;;  %s636_s1 = inlined_call_operand.hbm [shape: f32[2,8,128], index: 1, kind: output, shape index: {}]  }
   0x1   :  { %8 = vsyncpa [#allocation4 + $0x1], 0 }
   0x2   :  { %9 = vsyncpa [#allocation5], 0 }
   0x3   :  { %11 = vsyncpa [#allocation5 + $0x1], 0  ;;  %s463_s6 = smov 0   ;;  %s465_s7 = smov 0  }
   0x4   :  { %s467_s8 = smov 0   ;;  %s469_s9 = smov 0  }
   0x5   :  { %s471_s10 = smov 0   ;;  %s473_s11 = smov 0  }
   0x6 LB: > { %s260_s12 = sadd.s32 4294967295, %s449_s11   ;;  %s261_s13 = sadd.s32 4294967294, %s449_s11   ;;  %s449_s11 = sphi %s473_s11, %s17_s11   ;;  %s445_s10 = sphi %s471_s10, %s652_s10   ;;  %s441_s9 = sphi %s469_s9, %s651_s9   ;;  %s437_s8 = sphi %s467_s8, %s650_s8   ;;  %s433_s7 = sphi %s465_s7, %s649_s7   ;;  %s429_s6 = sphi %s463_s6, %s648_s6  }
   0x7   : > { %s29_s14 = sadd.s32 1, %s445_s10  ;;  %s38_s15 = sadd.s32 1, %s437_s8 }
   0x8   : > { %p31_p0 = scmp.ge.s32.totalorder %s29_s14, 2  ;;  %p45_p1 = scmp.ne.s32.totalorder %s437_s8, %s433_s7 }
   0x9   : > { %p46_p2 = scmp.eq.s32.totalorder %s449_s11, 0  ;;  %p51_p3 = scmp.ne.s32.totalorder %s433_s7, %s429_s6 }
   0xa   : > { %s654_s14 = smov (%p31_p0, %s29_s14), 0  ;;  %p52_p5 = scmp.eq.s32.totalorder %s260_s12, 0 }
   0xb   : > { %p504_p4 = por %p46_p2, %p45_p1  ;;  %s35_s17 = ssub.s32 %s445_s10, %s654_s14 }
   0xc   : > { %p75_p6 = scmp.eq.s32.totalorder %s260_s12, 1  ;;  %p36_p7 = scmp.eq.s32.totalorder %s35_s17, 0 }
   0xd   : > { %p510_p8 = por %p52_p5, %p51_p3  ;;  %p81_p10 = scmp.eq.s32.totalorder %s261_s13, 1 }
   0xe   : > { %p514_p9 = por %p75_p6, %p45_p1  ;;  %p285_p13 = scmp.lt.s32.totalorder %s449_s11, 2 }
   0xf   : > { %s519_s20 = scalar_select %p36_p7, %s437_s8, %s38_s15  }
  0x10   : > { %s640_s19 = scalar_select %p514_p9, 1, 0 }
  0x11   : > { %p521_p11 = por %p81_p10, %p51_p3  ;;  %s101_s22 = sand.u32 1, %s437_s8  }
  0x12   : > { %s264_s23 = sshll.u32 %s101_s22, 3  ;;  %s265_s24 = sshll.u32 %s445_s10, 7 }
  0x13   : > { %s641_s21 = scalar_select %p521_p11, 1, 0 }
  0x14   : > { %s532_s27 = scalar_lea.hbm %s635_s0, %s265_s24  ;;  %s105_s28 = scalar_lea.vmem [#allocation3], %s264_s23 }
  0x15   : > { %s113_s29 = sshll.u32 %s105_s28, 4  ;;  %p538_p0 = pnand %p285_p13, %p504_p4  ;;  %s534_s29 = int_to_ptr.vmem [resolvable:$true] %s113_s29 }
  0x16   : > { %s102_s2 = scalar_lea.sflag [#allocation4], %s101_s22  ;;  %s337_s3 = scalar_lea.hbm %s532_s27, 128 }
  0x17   : > { %p338_p3 = scmp.ne.s32.totalorder %s532_s27, %s337_s3  ;;  %p339_p5 = pneg %p538_p0 }
  0x18   : > { %s342_s12 = scalar_lea.hbm %s635_s0, 256  ;;  %p343_p4 = scmp.lt.u32.totalorder %s532_s27, %s635_s0 }
  0x19   : > { %p340_p6 = pnand %p339_p5, %p338_p3  ;;  %p344_p10 = scmp.lt.u32.totalorder %s342_s12, %s337_s3 }
  0x1a   : > { %p346_p12 = scmp.lt.u32.totalorder %s337_s3, %s532_s27 }
  0x1b   : > { %p341_p7 = pneg %p340_p6  ;;  %p345_p13 = por %p344_p10, %p343_p4 }
  0x1d   : > { %p347_p1 = por %p346_p12, %p345_p13 }
  0x1f   : > { %p348_p2 = pnand %p347_p1, %p341_p7 }
  0x21   : > { %351 = shalt.err (!%p348_p2)
}
  0x22   : > { %s352_s16 = scalar_lea.vmem %s534_s29, 128  ;;  %s451_s17 = smov [#allocation3]  }
  0x23   : > { %p353_p3 = scmp.ne.s32.totalorder %s534_s29, %s352_s16  ;;  %s357_s22 = sshll.u32 %s451_s17, 4  ;;  %s358_s22 = int_to_ptr.vmem [resolvable:$false] %s357_s22 }
  0x24   : > { %s359_s23 = scalar_lea.vmem %s358_s22, 256  ;;  %p360_p9 = scmp.lt.s32.totalorder %s534_s29, %s358_s22 }
  0x25   : > { %p355_p6 = pnand %p353_p3, %p339_p5  ;;  %p361_p4 = scmp.lt.s32.totalorder %s359_s23, %s352_s16 }
  0x27   : > { %p356_p11 = pneg %p355_p6  ;;  %p362_p10 = por %p361_p4, %p360_p9 }
  0x29   : > { %p363_p12 = pnand %p362_p10, %p356_p11 }
  0x2b   : > { %366 = shalt.err (!%p363_p12)
}
  0x2c   : > { %280 = dma.hbm_to_vmem [thread:$0]  (!%p538_p0), %s532_s27, 128, %s534_s29, %s102_s2  }
  0x2d   : > { %p643_p1 = scmp.lt.s32.totalorder %s449_s11, 3  ;;  %p644_p2 = scmp.ge.s32.totalorder %s449_s11, 1 }
  0x2f   : > { %p119_p5 = pnand %p644_p2, %p643_p1 }
  0x30   : > { %s574_s24 = sand.u32 (!%p119_p5), 1, %s433_s7  }
  0x31   : > { %122 = sbr.rel (%p119_p5) target bundleno = 89 (0x59), region = 24  ;;  %s267_s25 = sshll.u32 (!%p119_p5), %s574_s24, 3 }
  0x32   : > { %s125_s26 = scalar_lea.sflag (!%p119_p5), [#allocation4], %s574_s24  ;;  %s128_s28 = scalar_lea.vmem (!%p119_p5), [#allocation3], %s267_s25 }
  0x38   : > { %420 = dma.done.wait (%p510_p8), %s125_s26, 128  }
  0x39   : > { %422 = vsyncadd (%p510_p8), %s125_s26, 4294967168  ;;  %v153_v0 = vld [vmem:[%s128_s28] sm:$0xff]  ;;  %s146_s27 = scalar_lea.vmem [#allocation6], %s267_s25  ;;  %s270_s30 = sshll.u32 %s441_s9, 7 }
  0x3a   : > { %v154_v1 = vmul.f32 0.5, %v153_v0  ;;  %s181_s29 = sshll.u32 %s146_s27, 4  ;;  %s588_s18 = scalar_lea.hbm %s636_s1, %s270_s30  ;;  %s583_s29 = int_to_ptr.vmem [resolvable:$true] %s181_s29 }
  0x3b   : > { %s168_s4 = scalar_lea.sflag [#allocation5], %s574_s24  ;;  %s367_s5 = scalar_lea.vmem %s583_s29, 128 }
  0x3c   : > { %335 = vtanh.f32 %v154_v1  ;;  %p368_p8 = scmp.ne.s32.totalorder %s583_s29, %s367_s5  ;;  %p645_p9 = scmp.ne.s32.totalorder %s640_s19, 0 }
  0x3d   : > { %s452_s9 = smov [#allocation6]  }
  0x3e   : > { %p369_p11 = pnand %p368_p8, %p645_p9  ;;  %s371_s12 = sshll.u32 %s452_s9, 4  ;;  %s372_s12 = int_to_ptr.vmem [resolvable:$false] %s371_s12 }
  0x3f   : > { %s373_s13 = scalar_lea.vmem %s372_s12, 256  ;;  %p374_p7 = scmp.lt.s32.totalorder %s583_s29, %s372_s12 }
  0x40   : > { %p370_p0 = pneg %p369_p11  ;;  %p375_p13 = scmp.lt.s32.totalorder %s373_s13, %s367_s5 }
  0x42   : > { %p376_p3 = por %p375_p13, %p374_p7 }
  0x44   : > { %p377_p6 = pnand %p376_p3, %p370_p0 }
  0x46   : > { %v336_v2 = vpop.eup %335 }
  0x47   : > { %v156_v3 = vadd.f32 1.0, %v336_v2 }
  0x49   : > { %v157_v4 = vmul.f32 0.5, %v156_v3 }
  0x4b   : > { %166 = vst [vmem:[%s146_s27] sm:$0xff] %v157_v4 }
  0x4c   : > { %380 = shalt.err (!%p377_p6)
}
  0x4d   : > { %s381_s15 = scalar_lea.hbm %s588_s18, 128  ;;  %s385_s22 = scalar_lea.hbm %s636_s1, 256 }
  0x4e   : > { %p382_p4 = scmp.ne.s32.totalorder %s588_s18, %s381_s15  ;;  %p386_p1 = scmp.lt.u32.totalorder %s588_s18, %s636_s1 }
  0x4f   : > { %p387_p2 = scmp.lt.u32.totalorder %s385_s22, %s381_s15  ;;  %p389_p8 = scmp.lt.u32.totalorder %s381_s15, %s588_s18 }
  0x50   : > { %p383_p10 = pnand %p382_p4, %p645_p9 }
  0x51   : > { %p388_p5 = por %p387_p2, %p386_p1 }
  0x52   : > { %p384_p12 = pneg %p383_p10 }
  0x53   : > { %p390_p11 = por %p389_p8, %p388_p5 }
  0x55   : > { %p391_p0 = pnand %p390_p11, %p384_p12 }
  0x57   : > { %394 = shalt.err (!%p391_p0)
}
  0x58   : > { %275 = dma.vmem_to_hbm [thread:$0]  (%p645_p9), %s583_s29, 128, %s588_s18, %s168_s4  }
  0x59 PF: > { %s193_s25 = sand.u32 1, %s429_s6   ;;  %p646_p7 = scmp.ne.s32.totalorder %s641_s21, 0 }
  0x5a   : > { %p647_p13 = scmp.ge.s32.totalorder %s449_s11, 2  ;;  %s194_s26 = scalar_lea.sflag [#allocation5], %s193_s25 }
  0x5c   : > { %p282_p3 = pnand %p647_p13, %p646_p7 }
  0x5e   : > { %424 = dma.done.wait (!%p282_p3), %s194_s26, 128  }
  0x5f   : > { %426 = vsyncadd (!%p282_p3), %s194_s26, 4294967168  ;;  %s17_s11 = sadd.s32 1, %s449_s11   ;;  %s648_s6 = smov %s433_s7 }
  0x60   : > { %p14_p6 = scmp.ge.s32.totalorder %s17_s11, 4   ;;  %s649_s7 = smov %s437_s8 }
  0x61   : > { %s650_s8 = smov %s519_s20  ;;  %s651_s9 = smov %s445_s10 }
  0x62   : > { %s652_s10 = smov %s654_s14  ;;  %16 = sbr.rel (!%p14_p6) target bundleno = 6 (0x6), region = 77 }
  0x69   :  { %199 = vsyncpa [#allocation4], 1 }
  0x6a   :  { %201 = vsyncpa [#allocation4 + $0x1], 1 }
  0x6b   :  { %202 = vsyncpa [#allocation5], 1 }
  0x6c   :  { %204 = vsyncpa [#allocation5 + $0x1], 1 }

</bundles_post_ra>
